<compile_context>
chip_gen: v7x
topology: tpu7x:2x2x1
jax: 0.10.0
libtpu: 0.0.40
codegen_flags: <defaults>
</compile_context>

<pallas_src>
import functools

import jax
import jax.numpy as jnp
from jax.experimental import pallas as pl
from jax.experimental.pallas import tpu as pltpu

_LANE = 1024                 # 8 sublanes * 128 lanes -> full-width vreg rows
_SMALL_N = 256 * 1024        # below this, a plain fused XLA op wins


def _sine_kernel(w0_ref, x_ref, o_ref):
    # w0 lives in SMEM as f32; its broadcast is a single sreg->vreg splat.
    # The elementwise chain is fused per-vreg by Mosaic, so no block-sized
    # f32 temporary is materialized.
    # Note (v7x): if jnp.sin lowers to a long VPU polynomial the kernel is
    # VALU-bound at 3.2 TB/s HBM; a shorter minimax polynomial (matched to the
    # output dtype) would recover the memory roofline there.
    w0 = w0_ref[0]
    x = x_ref[...].astype(jnp.float32)
    o_ref[...] = jnp.sin(w0 * x).astype(o_ref.dtype)


@functools.lru_cache(maxsize=1)
def _vmem_capacity_bytes():
    try:
        info = pltpu.get_tpu_info()
        cap = getattr(info, "vmem_capacity_bytes", None)
        if cap:
            return int(cap)
    except Exception:
        pass
    return 64 * 1024 * 1024   # conservative fallback: v7x per-TC VMEM


def _choose_tiling(rows, itemsize):
    """Pick (block_rows, vmem_limit_bytes) for a (rows, _LANE) slab."""
    vmem_cap = _vmem_capacity_bytes()
    if vmem_cap >= 100 * 1024 * 1024:          # v5e / v6e: 128 MiB VMEM
        target_block_bytes = 8 * 1024 * 1024
        vmem_budget = 48 * 1024 * 1024
    else:                                      # v7x (64 MiB / TC) or unknown
        target_block_bytes = 4 * 1024 * 1024
        vmem_budget = 32 * 1024 * 1024

    # Keep block *bytes* constant across dtypes (bf16 -> 2x the rows).
    block_rows = max(8, (target_block_bytes // (_LANE * itemsize)) // 8 * 8)

    if rows <= block_rows:
        if rows >= 16:
            # Split into two blocks so the "parallel" grid axis actually gives
            # both v7x TensorCores work; an extra grid step costs ~0.35 us.
            block_rows = ((rows + 1) // 2 + 7) // 8 * 8
        else:
            block_rows = rows                  # block == full array dim: legal

    block_bytes = block_rows * _LANE * itemsize
    # Double-buffered in + out blocks plus headroom; no f32-temp term (fused).
    vmem_limit = int(min(vmem_budget, 4 * block_bytes + (2 << 20)))
    return block_rows, vmem_limit


@functools.partial(jax.jit, static_argnames=("block_rows", "vmem_limit"))
def _sine_impl(x, w0_arr, *, block_rows, vmem_limit):
    orig_shape = x.shape
    orig_dtype = x.dtype
    itemsize = jnp.dtype(orig_dtype).itemsize
    n = x.size

    x_flat = jnp.ravel(x)
    n_main = (n // _LANE) * _LANE              # 1024-aligned prefix
    rows = n_main // _LANE
    x2d = (x_flat if n_main == n else x_flat[:n_main]).reshape(rows, _LANE)

    grid = (pl.cdiv(rows, block_rows),)
    out2d = pl.pallas_call(
        _sine_kernel,
        out_shape=jax.ShapeDtypeStruct((rows, _LANE), orig_dtype),
        grid_spec=pltpu.PrefetchScalarGridSpec(
            num_scalar_prefetch=0,
            grid=grid,
            in_specs=[
                pl.BlockSpec(memory_space=pltpu.MemorySpace.SMEM),     # w0
                pl.BlockSpec((block_rows, _LANE), lambda i: (i, 0)),   # x slab
            ],
            out_specs=pl.BlockSpec((block_rows, _LANE), lambda i: (i, 0)),
        ),
        compiler_params=pltpu.CompilerParams(
            dimension_semantics=("parallel",),   # shards across v7x's 2 TCs
            vmem_limit_bytes=vmem_limit,
        ),
        cost_estimate=pl.CostEstimate(
            flops=rows * _LANE,
            transcendentals=rows * _LANE,
            bytes_accessed=2 * rows * _LANE * itemsize,
        ),
    )(w0_arr, x2d)

    out_flat = out2d.reshape(-1)
    if n_main != n:
        # <=1023-element tail: a plain fused op here avoids the two extra
        # full-array HBM passes (pad copy + slice copy) of the padded path.
        tail = jnp.sin(w0_arr[0] * x_flat[n_main:].astype(jnp.float32))
        out_flat = jnp.concatenate([out_flat, tail.astype(orig_dtype)])
    return out_flat.reshape(orig_shape)


@jax.jit
def _sine_small(x, w0_arr):
    return jnp.sin(w0_arr[0] * x.astype(jnp.float32)).astype(x.dtype)


def sine_pallas(x, w0=1.0, *, min_pallas_elems=_SMALL_N):
    """y = sin(w0 * x), elementwise, via a Pallas TPU kernel."""
    x = jnp.asarray(x)
    if x.size == 0:
        return x
    # Keep w0 in f32 (casting it to a low-precision I/O dtype would perturb it).
    w0_arr = jnp.asarray([w0], dtype=jnp.float32)
    if x.size < max(min_pallas_elems, _LANE):
        # Fixed kernel-invocation / DMA-priming overhead dominates tiny tensors.
        return _sine_small(x, w0_arr)
    itemsize = jnp.dtype(x.dtype).itemsize
    rows = x.size // _LANE
    block_rows, vmem_limit = _choose_tiling(rows, itemsize)
    return _sine_impl(x, w0_arr, block_rows=block_rows, vmem_limit=vmem_limit)


if __name__ == "__main__":
    key = jax.random.PRNGKey(0)
    k1, k2, k3, k4 = jax.random.split(key, 4)
    w0 = 30.0   # typical SIREN w0; module default 1.0 also supported

    # 1) Small NCHW feature map (module-typical shape); force the Pallas path.
    x1 = jax.random.normal(k1, (2, 4, 16, 16), dtype=jnp.float32)
    y1 = jax.block_until_ready(sine_pallas(x1, w0=w0, min_pallas_elems=0))
    assert y1.shape == x1.shape and y1.dtype == x1.dtype
    assert jnp.allclose(y1, jnp.sin(jnp.float32(w0) * x1), atol=1e-4, rtol=1e-4)

    # 2) Larger map: multi-block grid with the default tiling heuristics.
    x2 = jax.random.normal(k2, (8, 4, 128, 128), dtype=jnp.float32)
    y2 = jax.block_until_ready(sine_pallas(x2, w0=w0))
    assert jnp.allclose(y2, jnp.sin(jnp.float32(w0) * x2), atol=1e-4, rtol=1e-4)

    # 3) Non-1024-aligned size: aligned-prefix kernel + fused jnp tail.
    x3 = jax.random.normal(k3, (600001,), dtype=jnp.float32)
    y3 = jax.block_until_ready(sine_pallas(x3, w0=1.0))
    assert jnp.allclose(y3, jnp.sin(x3), atol=1e-4, rtol=1e-4)

    # 4) bf16 I/O: block rows scale with itemsize; math stays f32 internally.
    x4 = jax.random.normal(k4, (8, 4, 128, 128), dtype=jnp.bfloat16)
    y4 = jax.block_until_ready(sine_pallas(x4, w0=w0))
    ref4 = jnp.sin(jnp.float32(w0) * x4.astype(jnp.float32)).astype(jnp.bfloat16)
    assert y4.dtype == jnp.bfloat16
    assert jnp.allclose(y4.astype(jnp.float32), ref4.astype(jnp.float32),
                        atol=2e-2, rtol=2e-2)

    # 5) Tiny-input bypass path (plain fused XLA op).
    x5 = jax.random.normal(k1, (3, 5, 7), dtype=jnp.float32)
    y5 = jax.block_until_ready(sine_pallas(x5, w0=1.0))
    assert jnp.allclose(y5, jnp.sin(x5), atol=1e-5, rtol=1e-5)

    print("KERNEL_OK")
</pallas_src>

<mosaic_0001>
module attributes {stable_mosaic.version = 11 : i64} {
  func.func @_sine_kernel(%arg0: i32, %arg1: memref<1xf32, #tpu.memory_space<smem>>, %arg2: memref<2x1024xf32, #tpu.memory_space<vmem>>, %arg3: memref<2x1024xf32, #tpu.memory_space<vmem>>) attributes {dimension_semantics = [#tpu.dimension_semantics<parallel>], iteration_bounds = array<i64: 1>, scalar_prefetch = 0 : i64, scratch_operands = 0 : i64, tpu.core_type = #tpu.core_type<tc>, window_params = [{transform_indices = @transform_0, window_bounds = array<i64: 1>}, {transform_indices = @transform_1, window_bounds = array<i64: 2, 1024>}, {transform_indices = @transform_2, window_bounds = array<i64: 2, 1024>}]} {
    %c0 = arith.constant 0 : index
    %0 = memref.load %arg1[%c0] : memref<1xf32, #tpu.memory_space<smem>>
    %c0_0 = arith.constant 0 : index
    %c0_1 = arith.constant 0 : index
    %1 = vector.load %arg2[%c0_0, %c0_1] : memref<2x1024xf32, #tpu.memory_space<vmem>>, vector<2x1024xf32>
    %2 = vector.broadcast %0 : f32 to vector<2x1024xf32>
    %3 = arith.mulf %2, %1 : vector<2x1024xf32>
    %4 = math.sin %3 : vector<2x1024xf32>
    %c0_2 = arith.constant 0 : index
    %c0_3 = arith.constant 0 : index
    %5 = vector.load %arg3[%c0_2, %c0_3] : memref<2x1024xf32, #tpu.memory_space<vmem>>, vector<2x1024xf32>
    tpu.vector_store %arg3[%c0_2, %c0_3], %4 {strides = array<i32>} : memref<2x1024xf32, #tpu.memory_space<vmem>>, vector<2x1024xf32>,
    return
  }
  func.func @transform_0(%arg0: i32) -> i32 {
    %c0_i32 = arith.constant 0 : i32
    %c0_i32_0 = arith.constant 0 : i32
    return %c0_i32 : i32
  }
  func.func @transform_1(%arg0: i32) -> (i32, i32) {
    %c0_i32 = arith.constant 0 : i32
    %c0_i32_0 = arith.constant 0 : i32
    return %arg0, %c0_i32 : i32, i32
  }
  func.func @transform_2(%arg0: i32) -> (i32, i32) {
    %c0_i32 = arith.constant 0 : i32
    %c0_i32_0 = arith.constant 0 : i32
    return %arg0, %c0_i32 : i32, i32
  }
}

</mosaic_0001>

<bundles_post_ra>
// kernel: _sine_impl.1
= control target key start
LH: loop header
LB: loop body
LE: loop exit
PB: predicated region body
PF: predicated region fallthrough
CT: control target
= control target key end

     0   :  { %v262_v27 = vmov 683565275   ;;  %v263_v29 = vmov 2475754826   ;;  %v264_v31 = vmov 2131351028   ;;  %s368_s0 = inlined_call_operand.<no memory space> [shape: f32[1], index: 0, kind: input, shape index: {}]   ;;  %s369_s1 = inlined_call_operand.vmem [shape: f32[2,1024], index: 1, kind: input, shape index: {}]   ;;  %s370_s2 = inlined_call_operand.vmem [shape: f32[2,1024], index: 2, kind: output, shape index: {}]  }
   0x1   :  { %v13_v0 = vld [vmem:[%s369_s1] sm:$0xff]  ;;  %v14_v1 = vld [vmem:[%s369_s1 + $0x8] sm:$0xff]  ;;  %v15_v2 = vstv %s368_s0  ;;  %v265_v33 = vmov 2102212464   ;;  %v266_v35 = vmov 920167782  }
   0x2   :  { %v292_v3 = vmul.f32 %v15_v2, %v13_v0  ;;  %v294_v4 = vmul.f32 %v15_v2, %v14_v1  ;;  %v267_v43 = vmov 1326507024  }
   0x4   :  { %v18_v5 = vand.u32 2147483647, %v292_v3  ;;  %v21_v6 = vand.u32 2139095040, %v292_v3  ;;  %v122_v7 = vand.u32 2147483647, %v294_v4  ;;  %v125_v8 = vand.u32 2139095040, %v294_v4 }
   0x5   :  { %vm20_vm14 = vcmp.lt.s32.totalorder %v292_v3, 0 }
   0x6   :  { %v22_v9 = vshrl.u32 %v21_v6, 23  ;;  %v25_v10 = vand.u32 8388607, %v18_v5  ;;  %v126_v11 = vshrl.u32 %v125_v8, 23  ;;  %v129_v12 = vand.u32 8388607, %v122_v7 }
   0x7   :  { %vm19_vm15 = vcmp.le.f32.partialorder %v18_v5, 0.7853982 }
   0x8   :  { %v232_v13 = vadd.s32 4294967169, %v22_v9  ;;  %v236_v14 = vadd.s32 4294967169, %v126_v11  ;;  %v26_v16 = vor.u32 8388608, %v25_v10  ;;  %v130_v17 = vor.u32 8388608, %v129_v12 }
   0xa   :  { %v28_v15 = vadd.s32 1, %v232_v13  ;;  %v132_v18 = vadd.s32 1, %v236_v14  ;;  %v304_v23 = vshll.u32 %v26_v16, 8  ;;  %v306_v25 = vshll.u32 %v130_v17, 8 }
   0xc   :  { %vm29_vm0 = vcmp.gt.s32.totalorder %v28_v15, 0  ;;  %vm133_vm1 = vcmp.gt.s32.totalorder %v132_v18, 0 }
   0xd   :  { %v30_v19 = vsel %vm29_vm0, %v28_v15, 0  ;;  %v134_v22 = vsel %vm133_vm1, %v132_v18, 0  ;;  %vm124_vm0 = vcmp.lt.s32.totalorder %v294_v4, 0  ;;  %vm123_vm1 = vcmp.le.f32.partialorder %v122_v7, 0.7853982 }
   0xe   :  { %v31_v20 = vshrl.u32 %v30_v19, 5  ;;  %v32_v21 = vand.u32 31, %v30_v19  ;;  %v136_v24 = vand.u32 31, %v134_v22  ;;  %v308_v37 = vshrl.u32 %v134_v22, 5 }
  0x10   :  { %v33_v26 = vsub.s32 32, %v32_v21  ;;  %v35_v28 = vshll.u32 %v262_v27, %v32_v21  ;;  %v38_v30 = vshll.u32 %v263_v29, %v32_v21  ;;  %v41_v32 = vshll.u32 %v264_v31, %v32_v21 }
  0x11   :  { %v44_v34 = vshll.u32 %v265_v33, %v32_v21  ;;  %v47_v36 = vshll.u32 %v266_v35, %v32_v21  ;;  %vm50_vm2 = vcmp.lt.s32.totalorder %v31_v20, 1  ;;  %vm51_vm3 = vcmp.lt.s32.totalorder %v31_v20, 2 }
  0x12   :  { %v34_v38 = vshrl.u32 %v262_v27, %v33_v26  ;;  %v36_v39 = vshrl.u32 %v263_v29, %v33_v26  ;;  %v39_v40 = vshrl.u32 %v264_v31, %v33_v26  ;;  %v42_v41 = vshrl.u32 %v265_v33, %v33_v26 }
  0x13   :  { %v45_v42 = vshrl.u32 %v266_v35, %v33_v26  ;;  %v48_v44 = vshrl.u32 %v267_v43, %v33_v26  ;;  %vm53_vm4 = vcmp.lt.s32.totalorder %v31_v20, 4  ;;  %v137_v48 = vsub.s32 32, %v136_v24 }
  0x14   :  { %v37_v45 = vor.u32 %v36_v39, %v35_v28  ;;  %v40_v46 = vor.u32 %v39_v40, %v38_v30  ;;  %v43_v47 = vor.u32 %v42_v41, %v41_v32  ;;  %vm52_vm5 = vcmp.lt.s32.totalorder %v31_v20, 3 }
  0x15   :  { %v46_v49 = vor.u32 %v45_v42, %v44_v34  ;;  %v49_v50 = vor.u32 %v48_v44, %v47_v36  ;;  %v139_v51 = vshll.u32 %v262_v27, %v136_v24  ;;  %v142_v59 = vshll.u32 %v263_v29, %v136_v24 }
  0x16   :  { %v54_v52 = vsel %vm50_vm2, %v34_v38, %v37_v45  ;;  %v55_v53 = vsel %vm53_vm4, %v43_v47, 2102212464  ;;  %v58_v54 = vsel %vm50_vm2, %v37_v45, %v40_v46  ;;  %v62_v55 = vsel %vm50_vm2, %v40_v46, %v43_v47 }
  0x17   :  { %v56_v56 = vsel %vm52_vm5, %v40_v46, %v55_v53  ;;  %v59_v57 = vsel %vm53_vm4, %v46_v49, 920167782  ;;  %v63_v58 = vsel %vm53_vm4, %v49_v50, 1326507024  ;;  %v138_v62 = vshrl.u32 %v262_v27, %v137_v48 }
  0x18   :  { %v60_v60 = vsel %vm52_vm5, %v43_v47, %v59_v57  ;;  %v64_v61 = vsel %vm52_vm5, %v46_v49, %v63_v58  ;;  %v140_v63 = vshrl.u32 %v263_v29, %v137_v48  ;;  %v57_v0 = vsel %vm51_vm3, %v54_v52, %v56_v56 }
  0x19   :  { %v61_v1 = vsel %vm51_vm3, %v58_v54, %v60_v60  ;;  %v65_v2 = vsel %vm51_vm3, %v62_v55, %v64_v61  ;;  %v143_v6 = vshrl.u32 %v264_v31, %v137_v48  ;;  %v145_v14 = vshll.u32 %v264_v31, %v136_v24 }
  0x1a   :  { %v317_v8 = vmul.u32.u64.low %v304_v23, %v65_v2  ;;  %v318_v9 = vmul.u32.u64.high %v304_v23, %v65_v2, %v317_v8  ;;  %v321_v10 = vmul.u32.u64.low %v304_v23, %v61_v1  ;;  %v322_v11 = vmul.u32.u64.high %v304_v23, %v61_v1, %v321_v10 }
  0x1b   :  { %v141_v12 = vor.u32 %v140_v63, %v139_v51  ;;  %v144_v13 = vor.u32 %v143_v6, %v142_v59  ;;  %v146_v15 = vshrl.u32 %v265_v33, %v137_v48  ;;  %v148_v16 = vshll.u32 %v265_v33, %v136_v24 }
  0x1c   :  { %v149_v17 = vshrl.u32 %v266_v35, %v137_v48  ;;  %v151_v18 = vshll.u32 %v266_v35, %v136_v24  ;;  %v152_v19 = vshrl.u32 %v267_v43, %v137_v48  ;;  %v73_v20 = vmul.u32 %v304_v23, %v57_v0 }
  0x1d   :  { %v147_v21 = vor.u32 %v146_v15, %v145_v14  ;;  %vm154_vm6 = vcmp.lt.s32.totalorder %v308_v37, 1  ;;  %vm155_vm7 = vcmp.lt.s32.totalorder %v308_v37, 2  ;;  %vm75_vm8 = vc.u32 %v318_v9, %v321_v10 }
  0x1e   :  { %v76_v22 = vadd.s32 1, %v322_v11  ;;  %v150_v26 = vor.u32 %v149_v17, %v148_v16  ;;  %vm156_vm9 = vcmp.lt.s32.totalorder %v308_v37, 3  ;;  %v153_v27 = vor.u32 %v152_v19, %v151_v18 }
  0x1f   :  { %vm157_vm10 = vcmp.lt.s32.totalorder %v308_v37, 4  ;;  %v158_v28 = vsel %vm154_vm6, %v138_v62, %v141_v12  ;;  %v162_v24 = vsel %vm154_vm6, %v141_v12, %v144_v13  ;;  %v166_v31 = vsel %vm154_vm6, %v144_v13, %v147_v21 }
  0x20   :  { %v77_v29 = vsel %vm75_vm8, %v76_v22, %v322_v11  ;;  %v159_v23 = vsel %vm157_vm10, %v147_v21, 2102212464  ;;  %v163_v30 = vsel %vm157_vm10, %v150_v26, 920167782  ;;  %v167_v35 = vsel %vm157_vm10, %v153_v27, 1326507024 }
  0x21   :  { %v78_v32 = vadd.s32 %v77_v29, %v73_v20  ;;  %v160_v33 = vsel %vm156_vm9, %v144_v13, %v159_v23  ;;  %v164_v34 = vsel %vm156_vm9, %v147_v21, %v163_v30  ;;  %v168_v39 = vsel %vm156_vm9, %v150_v26, %v167_v35 }
  0x22   :  { %v161_v36 = vsel %vm155_vm7, %v158_v28, %v160_v33  ;;  %v165_v38 = vsel %vm155_vm7, %v162_v24, %v164_v34  ;;  %v169_v41 = vsel %vm155_vm7, %v166_v31, %v168_v39  ;;  %v74_v60 = vadd.s32 %v321_v10, %v318_v9 }
  0x23   :  { %v79_v40 = vadd.s32 536870912, %v78_v32  ;;  %v339_v42 = vmul.u32.u64.low %v306_v25, %v165_v38  ;;  %v340_v43 = vmul.u32.u64.high %v306_v25, %v165_v38, %v339_v42  ;;  %v177_v47 = vmul.u32 %v306_v25, %v161_v36 }
  0x24   :  { %v343_v44 = vmul.u32.u64.low %v306_v25, %v169_v41  ;;  %v344_v45 = vmul.u32.u64.high %v306_v25, %v169_v41, %v343_v44  ;;  %vm110_vm5 = vweird.f32 %v292_v3  ;;  %vm214_vm9 = vweird.f32 %v294_v4 }
  0x25   :  { %v80_v46 = vshrl.u32 %v79_v40, 30  ;;  %v180_v49 = vadd.s32 1, %v340_v43 }
  0x26   :  { %vm179_vm11 = vc.u32 %v344_v45, %v339_v42  ;;  %v178_v16 = vadd.s32 %v339_v42, %v344_v45 }
  0x27   :  { %v81_v48 = vshll.u32 %v80_v46, 30  ;;  %v181_v37 = vsel %vm179_vm11, %v180_v49, %v340_v43  ;;  %v104_v9 = vsub.s32 4, %v80_v46 }
  0x28   :  { %v182_v51 = vadd.s32 %v181_v37, %v177_v47 }
  0x29   :  { %v82_v50 = vsub.s32 %v78_v32, %v81_v48  ;;  %v105_v28 = vsel %vm20_vm14, %v104_v9, %v80_v46 }
  0x2a   :  { %v183_v53 = vadd.s32 536870912, %v182_v51  ;;  %v107_v31 = vsel %vm19_vm15, 0, %v105_v28 }
  0x2b   :  { %v84_v52 = vsub.s32 0, %v82_v50  ;;  %v111_v36 = vadd.s32 3, %v107_v31 }
  0x2c   :  { %v184_v55 = vshrl.u32 %v183_v53, 30 }
  0x2d   :  { %v233_v54 = vmin.u32 %v84_v52, %v82_v50  ;;  %v112_v40 = vand.u32 3, %v111_v36 }
  0x2e   :  { %v185_v57 = vshll.u32 %v184_v55, 30  ;;  %v208_v35 = vsub.s32 4, %v184_v55 }
  0x2f   :  { %v86_v56 = vclz %v233_v54  ;;  %vm117_vm2 = vcmp.eq.s32.totalorder %v112_v40, 2  ;;  %vm114_vm3 = vcmp.eq.s32.totalorder %v112_v40, 0  ;;  %vm113_vm4 = vcmp.lt.s32.totalorder %v112_v40, 2 }
  0x30   :  { %v186_v59 = vsub.s32 %v182_v51, %v185_v57  ;;  %v209_v39 = vsel %vm124_vm0, %v208_v35, %v184_v55 }
  0x31   :  { %v234_v58 = vadd.s32 4294967294, %v86_v56  ;;  %v211_v43 = vsel %vm123_vm1, 0, %v209_v39 }
  0x32   :  { %v188_v61 = vsub.s32 0, %v186_v59  ;;  %v215_v47 = vadd.s32 3, %v211_v43 }
  0x33   :  { %vm235_vm12 = vcmp.lt.s32.totalorder %v234_v58, 0 }
  0x34   :  { %v89_v25 = vsel %vm235_vm12, 0, %v234_v58  ;;  %v237_v1 = vmin.u32 %v188_v61, %v186_v59  ;;  %v216_v37 = vand.u32 3, %v215_v47 }
  0x35   :  { %v90_v62 = vsub.s32 32, %v89_v25  ;;  %v91_v63 = vshll.u32 %v82_v50, %v89_v25  ;;  %v94_v0 = vsub.s32 4294967266, %v89_v25 }
  0x36   :  { %v190_v8 = vclz %v237_v1  ;;  %vm221_vm6 = vcmp.eq.s32.totalorder %v216_v37, 2  ;;  %vm218_vm7 = vcmp.eq.s32.totalorder %v216_v37, 0  ;;  %vm217_vm8 = vcmp.lt.s32.totalorder %v216_v37, 2 }
  0x37   :  { %v92_v2 = vshrl.u32 %v74_v60, %v90_v62  ;;  %v95_v6 = vadd.s32 127, %v94_v0 }
  0x38   :  { %v238_v13 = vadd.s32 4294967294, %v190_v8 }
  0x39   :  { %v93_v11 = vor.u32 %v92_v2, %v91_v63  ;;  %v96_v12 = vshll.u32 %v95_v6, 23 }
  0x3a   :  { %vm239_vm13 = vcmp.lt.s32.totalorder %v238_v13, 0 }
  0x3b   :  { %v97_v14 = vor.u32 4788187, %v96_v12  ;;  %v100_v15 = vcvt.s32.f32 %v93_v11  ;;  %v193_v10 = vsel %vm239_vm13, 0, %v238_v13 }
  0x3c   :  { %v194_v18 = vsub.s32 32, %v193_v10  ;;  %v195_v19 = vshll.u32 %v186_v59, %v193_v10  ;;  %v198_v20 = vsub.s32 4294967266, %v193_v10 }
  0x3d   :  { %v98_v17 = vand.u32 2147483647, %v97_v14 }
  0x3e   :  { %v196_v22 = vshrl.u32 %v178_v16, %v194_v18  ;;  %v199_v26 = vadd.s32 127, %v198_v20 }
  0x3f   :  { %v101_v21 = vmul.f32 %v100_v15, %v98_v17 }
  0x40   :  { %v197_v24 = vor.u32 %v196_v22, %v195_v19  ;;  %v200_v29 = vshll.u32 %v199_v26, 23 }
  0x41   :  { %v102_v27 = vxor.u32 2147483648, %v101_v21 }
  0x42   :  { %v201_v32 = vor.u32 4788187, %v200_v29  ;;  %v204_v33 = vcvt.s32.f32 %v197_v24 }
  0x43   :  { %v103_v23 = vsel %vm20_vm14, %v102_v27, %v101_v21 }
  0x44   :  { %v106_v30 = vsel %vm19_vm15, %v292_v3, %v103_v23  ;;  %v202_v34 = vand.u32 2147483647, %v201_v32 }
  0x45   :  { %254 = vcosq.f32 %v106_v30 }
  0x46   :  { %256 = vsinq.f32 %v106_v30  ;;  %v205_v38 = vmul.f32 %v204_v33, %v202_v34 }
  0x48   :  { %v206_v5 = vxor.u32 2147483648, %v205_v38 }
  0x4a   :  { %v207_v41 = vsel %vm124_vm0, %v206_v5, %v205_v38 }
  0x4b   :  { %v210_v42 = vsel %vm123_vm1, %v294_v4, %v207_v41 }
  0x4c   :  { %258 = vcosq.f32 %v210_v42 }
  0x4d   :  { %260 = vsinq.f32 %v210_v42 }
  0x4f   :  { %v255_v44 = vpop.eup %254 }
  0x50   :  { %v257_v45 = vpop.eup %256  ;;  %v118_v46 = vxor.u32 2147483648, %v255_v44 }
  0x51   :  { %v115_v48 = vxor.u32 2147483648, %v257_v45 }
  0x52   :  { %v119_v7 = vsel %vm117_vm2, %v118_v46, %v257_v45 }
  0x53   :  { %v116_v49 = vsel %vm114_vm3, %v255_v44, %v115_v48 }
  0x54   :  { %v120_v50 = vsel %vm113_vm4, %v116_v49, %v119_v7 }
  0x55   :  { %v121_v51 = vsel %vm110_vm5, nan, %v120_v50 }
  0x56   :  { %226 = vst [vmem:[%s370_s2] sm:$0xff] %v121_v51  ;;  %v259_v52 = vpop.eup %258 }
  0x57   :  { %v261_v53 = vpop.eup %260  ;;  %v222_v54 = vxor.u32 2147483648, %v259_v52 }
  0x58   :  { %v219_v55 = vxor.u32 2147483648, %v261_v53 }
  0x59   :  { %v223_v56 = vsel %vm221_vm6, %v222_v54, %v261_v53 }
  0x5a   :  { %v220_v3 = vsel %vm218_vm7, %v259_v52, %v219_v55 }
  0x5b   :  { %v224_v57 = vsel %vm217_vm8, %v220_v3, %v223_v56 }
  0x5c   :  { %v225_v58 = vsel %vm214_vm9, nan, %v224_v57 }
  0x5d   :  { %227 = vst [vmem:[%s370_s2 + $0x8] sm:$0xff] %v225_v58 }

</bundles_post_ra>
